<compile_context>
chip_gen: v7x
topology: tpu7x:2x2x1
jax: 0.10.0
libtpu: 0.0.40
codegen_flags: <defaults>
</compile_context>

<pallas_src>
import functools

import jax
import jax.numpy as jnp
from jax.experimental import pallas as pl
from jax.experimental.pallas import tpu as pltpu


_LANE = 128


def _cdiv(a, b):
    return -(-a // b)


def _round_up(a, b):
    return _cdiv(a, b) * b


def _vmem_params():
    """(tile-sizing budget, vmem_limit_bytes) derived from the chip's VMEM."""
    try:
        cap = int(pltpu.get_tpu_info().vmem_capacity_bytes)
    except Exception:
        cap = 64 * 1024 * 1024                       # assume smallest (v7x)
    if cap >= 128 * 1024 * 1024:                     # v5e / v6e
        return 80 * 1024 * 1024, 112 * 1024 * 1024
    # v7x (64 MiB physical): leave headroom rather than running to the top.
    return 40 * 1024 * 1024, 52 * 1024 * 1024


def _choose_tiling(M, in_features, out_features, rank,
                   x_bytes, w_bytes, out_bytes, budget):
    """Pick (tm, tn, grid_m, grid_n).

    tm: largest sublane-aligned row tile fitting the VMEM budget (capped at the
        measured mem-bound sweet spot of 1024 rows), balanced so the tail tile
        isn't mostly padding and grid_m is even when >1 (v7x megacore balance).
    tn: full out_features unless the layer is so wide that tm would collapse,
        in which case out_features is tiled in lane-dense multiples of 128.
    """
    # Sublane rounding based on the *narrowest* dtype touching VMEM tiles.
    sub = max(8, 32 // max(min(x_bytes, w_bytes, out_bytes), 1))
    sub_w = max(8, 32 // max(w_bytes, 1))
    in_pad = _round_up(in_features, _LANE)
    rank_lane = _round_up(rank, _LANE)
    rank_sub = _round_up(rank, sub_w)

    def w_vmem(tn_):
        # down weight: (rank, in_features) tile, single pipeline buffer.
        wd = rank_sub * in_pad * w_bytes
        # up weight: (rank, tn) tile; 1 buffer when grid-invariant, else 2.
        n_buf = 1 if tn_ >= out_features else 2
        wu = n_buf * rank_sub * _round_up(tn_, _LANE) * w_bytes
        return wd + wu

    def per_row(tn_):
        tn_pad = _round_up(tn_, _LANE)
        return (2 * in_pad * x_bytes               # x tile (double-buffered)
                + in_pad * w_bytes                 # in-kernel cast of x
                + rank_lane * (2 * 4 + w_bytes)    # f32 down, scaled, cast
                + tn_pad * 4                       # f32 up accumulator
                + 2 * tn_pad * out_bytes)          # output tile (double-buf)

    def tm_for(tn_):
        avail = budget - w_vmem(tn_)
        if avail <= 0:
            return sub                             # pathological but correct
        return int(max(sub, min(1024, (avail // per_row(tn_)) // sub * sub)))

    tn = out_features
    tm = tm_for(tn)
    if tm < 256 and out_features > 1024:
        # Wide output: tile out_features so tm stays near the roofline sweet
        # spot; tn is always a lane-dense multiple of 128.
        tn = max(_LANE, min(2048, _round_up(_cdiv(out_features, 4), _LANE)))
        while tm_for(tn) < 256 and tn > 512:
            tn = max(_LANE, _round_up(tn // 2, _LANE))
        tm = tm_for(tn)

    tm = min(tm, _round_up(M, sub))
    tm = max(tm, sub)

    grid_m = _cdiv(M, tm)
    if grid_m > 1:
        if grid_m % 2:
            grid_m += 1            # even split across v7x's two TensorCores
        tm = max(sub, _round_up(_cdiv(M, grid_m), sub))
        grid_m = _cdiv(M, tm)
    grid_n = _cdiv(out_features, tn)
    return int(tm), int(tn), int(grid_m), int(grid_n)


def _lora_kernel(x_ref, wd_ref, wu_ref, o_ref, *, scale):
    # x_ref : (tm, in_features)   activation tile, original dtype
    # wd_ref: (rank, in_features) down-proj weight, torch layout (lane-dense)
    # wu_ref: (rank, tn)          up-proj weight, pre-transposed once
    # o_ref : (tm, tn)
    wd = wd_ref[...]
    wu = wu_ref[...]
    # torch's `hidden_states.to(dtype)` done in-kernel (free under DMA slack).
    x = x_ref[...].astype(wd.dtype)
    # down = x @ wd.T : contract the lane dims of both operands so the
    # (rank, in_features) weight tile never needs a lane-padded transpose.
    down = jax.lax.dot_general(
        x, wd, dimension_numbers=(((1,), (1,)), ((), ())),
        preferred_element_type=jnp.float32)
    if scale != 1.0:
        # Scale on the (tm, rank) tile, not the (tm, tn) result:
        # out_features/rank fewer multiplies in the store epilogue.
        down = down * scale
    # Keep both MXU operands in the (possibly narrow) weight dtype; f32 accum.
    up = jnp.dot(down.astype(wu.dtype), wu, preferred_element_type=jnp.float32)
    o_ref[...] = up.astype(o_ref.dtype)


def prepare_lora_weights(w_down, w_up):
    """One-time weight prep; cache the result with the weights (not per call).

    w_down: (rank, in_features)  torch nn.Linear layout -- kept as-is.
    w_up:   (out_features, rank) torch nn.Linear layout -- transposed once so
            the up-proj VMEM tile is lane-dense along out_features.
    """
    return w_down, w_up.T


def lora_linear(hidden_states, w_down, w_up_t, *, network_alpha=None,
                tm=None, tn=None):
    """Fused LoRA forward: up(down(x.to(w_dtype))) [* alpha/rank] -> x.dtype.

    hidden_states: (..., in_features), any float dtype.
    w_down: (rank, in_features)   -- torch layout (from prepare_lora_weights)
    w_up_t: (rank, out_features)  -- pre-transposed (from prepare_lora_weights)
    """
    orig_dtype = hidden_states.dtype
    rank, in_features = w_down.shape
    rank_u, out_features = w_up_t.shape
    assert rank == rank_u, "w_down / w_up rank mismatch"
    assert hidden_states.shape[-1] == in_features
    lead_shape = hidden_states.shape[:-1]

    x = hidden_states.reshape(-1, in_features)     # flatten leading dims
    M = x.shape[0]

    x_bytes = jnp.dtype(orig_dtype).itemsize
    w_bytes = jnp.dtype(w_down.dtype).itemsize
    out_bytes = x_bytes

    budget, vmem_limit = _vmem_params()
    auto_tm, auto_tn, grid_m, grid_n = _choose_tiling(
        M, in_features, out_features, rank, x_bytes, w_bytes, out_bytes, budget)
    if tm is not None:
        auto_tm, grid_m = int(tm), _cdiv(M, int(tm))
    if tn is not None:
        auto_tn, grid_n = int(tn), _cdiv(out_features, int(tn))
    tm, tn = auto_tm, auto_tn

    scale = 1.0 if network_alpha is None else float(network_alpha) / rank
    kernel = functools.partial(_lora_kernel, scale=scale)

    cost = pl.CostEstimate(
        flops=2 * M * rank * (in_features * grid_n + out_features),
        transcendentals=0,
        bytes_accessed=(M * in_features * x_bytes
                        + M * out_features * out_bytes
                        + (in_features + out_features) * rank * w_bytes),
    )

    # Up-proj weight: fully resident (single buffer) when not N-tiled;
    # default double-buffering when it changes along the inner N axis.
    if grid_n == 1:
        wu_spec = pl.BlockSpec((rank, tn), lambda i, j: (0, 0),
                               pipeline_mode=pl.Buffered(1))
    else:
        wu_spec = pl.BlockSpec((rank, tn), lambda i, j: (0, j))

    out = pl.pallas_call(
        kernel,
        out_shape=jax.ShapeDtypeStruct((M, out_features), orig_dtype),
        grid_spec=pltpu.PrefetchScalarGridSpec(
            num_scalar_prefetch=0,
            grid=(grid_m, grid_n),
            in_specs=[
                # x: invariant along the inner N axis -> DMA'd once per row
                # tile even when out_features is tiled.
                pl.BlockSpec((tm, in_features), lambda i, j: (i, 0)),
                # down weight: grid-invariant & tiny -> one resident buffer.
                pl.BlockSpec((rank, in_features), lambda i, j: (0, 0),
                             pipeline_mode=pl.Buffered(1)),
                wu_spec,
            ],
            out_specs=pl.BlockSpec((tm, tn), lambda i, j: (i, j)),
        ),
        compiler_params=pltpu.CompilerParams(
            # TODO(synk): if a profile shows the row axis isn't sharded across
            # v7x's two TensorCores, switch that axis to pltpu.CORE_PARALLEL.
            dimension_semantics=("parallel", "parallel"),
            vmem_limit_bytes=vmem_limit,
        ),
        cost_estimate=cost,
    )(x, w_down, w_up_t)

    return out.reshape(*lead_shape, out_features)


def _ref_lora(x, w_down, w_up, network_alpha):
    """Pure-JAX reference mirroring the module / kernel math (f32 accum)."""
    orig_dtype = x.dtype
    cdt = w_down.dtype
    rank = w_down.shape[0]
    d = jnp.dot(x.astype(cdt), w_down.T, preferred_element_type=jnp.float32,
                precision=jax.lax.Precision.HIGHEST)
    if network_alpha is not None:
        d = d * (float(network_alpha) / rank)
    u = jnp.dot(d.astype(cdt), w_up.T, preferred_element_type=jnp.float32,
                precision=jax.lax.Precision.HIGHEST)
    return u.astype(orig_dtype)


if __name__ == "__main__":
    # Small shapes consistent with the module: (batch, seq, in_features).
    batch, seq = 2, 8
    in_features, out_features, rank = 32, 32, 4
    network_alpha = 8.0

    key = jax.random.PRNGKey(0)
    kx, kd, ku = jax.random.split(key, 3)

    # down: normal(std=1/rank) per the module's __init__.
    w_down = jax.random.normal(kd, (rank, in_features), jnp.float32) * (1.0 / rank)
    # The module zero-inits `up`; use small nonzero values so the compute path
    # is actually exercised (zeros would make any kernel "pass").
    w_up = jax.random.normal(ku, (out_features, rank), jnp.float32) * 0.02

    hidden_states = jax.random.normal(kx, (batch, seq, in_features), jnp.float32)

    # One-time weight prep (what a module would cache at weight-load time).
    wd_p, wu_t = prepare_lora_weights(w_down, w_up)

    # 1) f32 weights / f32 activations (torch defaults).
    y = jax.block_until_ready(
        lora_linear(hidden_states, wd_p, wu_t, network_alpha=network_alpha))
    ref = _ref_lora(hidden_states, w_down, w_up, network_alpha)
    assert y.shape == (batch, seq, out_features)
    assert jnp.allclose(y, ref, atol=2e-3, rtol=2e-3), \
        float(jnp.max(jnp.abs(y - ref)))

    # 2) Row count not divisible by the tile: ragged final block handled by
    #    Pallas masking (no wrapper-side pad / slice any more).
    hs_tail = hidden_states[:, :seq - 1, :]          # M = 14 rows
    y_tail = jax.block_until_ready(
        lora_linear(hs_tail, wd_p, wu_t, network_alpha=network_alpha, tm=8))
    ref_tail = _ref_lora(hs_tail, w_down, w_up, network_alpha)
    assert y_tail.shape == (batch, seq - 1, out_features)
    assert jnp.allclose(y_tail, ref_tail, atol=2e-3, rtol=2e-3)

    # 3) bf16 weights / f32 activations (in-kernel cast + bf16 MXU path).
    wd_b, wu_b = prepare_lora_weights(w_down.astype(jnp.bfloat16),
                                      w_up.astype(jnp.bfloat16))
    y_b = jax.block_until_ready(
        lora_linear(hidden_states, wd_b, wu_b, network_alpha=network_alpha))
    ref_b = _ref_lora(hidden_states, w_down.astype(jnp.bfloat16),
                      w_up.astype(jnp.bfloat16), network_alpha)
    assert y_b.shape == (batch, seq, out_features)
    assert jnp.allclose(y_b, ref_b, atol=3e-2, rtol=3e-2)

    # 4) network_alpha=None path (scale multiply skipped entirely).
    y_n = jax.block_until_ready(lora_linear(hidden_states, wd_p, wu_t))
    ref_n = _ref_lora(hidden_states, w_down, w_up, None)
    assert jnp.allclose(y_n, ref_n, atol=2e-3, rtol=2e-3)

    print("KERNEL_OK")
</pallas_src>

<mosaic_0001>
module attributes {stable_mosaic.version = 11 : i64} {
  func.func @_lora_kernel(%arg0: i32, %arg1: i32, %arg2: memref<16x32xf32, #tpu.memory_space<vmem>>, %arg3: memref<4x32xf32, #tpu.memory_space<vmem>>, %arg4: memref<4x32xf32, #tpu.memory_space<vmem>>, %arg5: memref<16x32xf32, #tpu.memory_space<vmem>>) attributes {dimension_semantics = [#tpu.dimension_semantics<parallel>, #tpu.dimension_semantics<parallel>], iteration_bounds = array<i64: 1, 1>, scalar_prefetch = 0 : i64, scratch_operands = 0 : i64, tpu.core_type = #tpu.core_type<tc>, window_params = [{transform_indices = @transform_0, window_bounds = array<i64: 16, 32>}, {pipeline_mode = #tpu.pipeline_mode<synchronous>, transform_indices = @transform_1, window_bounds = array<i64: 4, 32>}, {pipeline_mode = #tpu.pipeline_mode<synchronous>, transform_indices = @transform_2, window_bounds = array<i64: 4, 32>}, {transform_indices = @transform_3, window_bounds = array<i64: 16, 32>}]} {
    %c0 = arith.constant 0 : index
    %c0_0 = arith.constant 0 : index
    %0 = vector.load %arg3[%c0, %c0_0] : memref<4x32xf32, #tpu.memory_space<vmem>>, vector<4x32xf32>
    %c0_1 = arith.constant 0 : index
    %c0_2 = arith.constant 0 : index
    %1 = vector.load %arg4[%c0_1, %c0_2] : memref<4x32xf32, #tpu.memory_space<vmem>>, vector<4x32xf32>
    %c0_3 = arith.constant 0 : index
    %c0_4 = arith.constant 0 : index
    %2 = vector.load %arg2[%c0_3, %c0_4] : memref<16x32xf32, #tpu.memory_space<vmem>>, vector<16x32xf32>
    %cst = arith.constant dense<0.000000e+00> : vector<16x4xf32>
    %3 = tpu.matmul %2, %0, %cst {dimension_numbers = #tpu.dot_dimension_numbers<[1], [1], [0], [0], [0, 0, 1, 0], [], []>} : vector<16x32xf32>, vector<4x32xf32>, vector<16x4xf32> -> vector<16x4xf32>
    %cst_5 = arith.constant 2.000000e+00 : f32
    %4 = vector.broadcast %cst_5 : f32 to vector<16x4xf32>
    %5 = arith.mulf %3, %4 : vector<16x4xf32>
    %cst_6 = arith.constant dense<0.000000e+00> : vector<16x32xf32>
    %6 = tpu.matmul %5, %1, %cst_6 {dimension_numbers = #tpu.dot_dimension_numbers<[1], [0], [0], [1], [0, 0, 1, 1], [], []>} : vector<16x4xf32>, vector<4x32xf32>, vector<16x32xf32> -> vector<16x32xf32>
    %c0_7 = arith.constant 0 : index
    %c0_8 = arith.constant 0 : index
    %7 = vector.load %arg5[%c0_7, %c0_8] : memref<16x32xf32, #tpu.memory_space<vmem>>, vector<16x32xf32>
    tpu.vector_store %arg5[%c0_7, %c0_8], %6 {strides = array<i32>} : memref<16x32xf32, #tpu.memory_space<vmem>>, vector<16x32xf32>,
    return
  }
  func.func @transform_0(%arg0: i32, %arg1: i32) -> (i32, i32) {
    %c0_i32 = arith.constant 0 : i32
    %c0_i32_0 = arith.constant 0 : i32
    return %arg0, %c0_i32 : i32, i32
  }
  func.func @transform_1(%arg0: i32, %arg1: i32) -> (i32, i32) {
    %c0_i32 = arith.constant 0 : i32
    %c0_i32_0 = arith.constant 0 : i32
    %c0_i32_1 = arith.constant 0 : i32
    return %c0_i32, %c0_i32_0 : i32, i32
  }
  func.func @transform_2(%arg0: i32, %arg1: i32) -> (i32, i32) {
    %c0_i32 = arith.constant 0 : i32
    %c0_i32_0 = arith.constant 0 : i32
    %c0_i32_1 = arith.constant 0 : i32
    return %c0_i32, %c0_i32_0 : i32, i32
  }
  func.func @transform_3(%arg0: i32, %arg1: i32) -> (i32, i32) {
    %c0_i32 = arith.constant 0 : i32
    return %arg0, %arg1 : i32, i32
  }
}

</mosaic_0001>

<bundles_post_ra>
// kernel: tpu_custom_call.1
= control target key start
LH: loop header
LB: loop body
LE: loop exit
PB: predicated region body
PF: predicated region fallthrough
CT: control target
= control target key end

     0   :  { %8 = vsyncpa [#allocation3], 0  ;;  %s413_s0 = inlined_call_operand.hbm [shape: f32[16,32], index: 0, kind: input, shape index: {}]   ;;  %s414_s1 = inlined_call_operand.hbm [shape: f32[4,32], index: 1, kind: input, shape index: {}]   ;;  %s415_s2 = inlined_call_operand.vmem [shape: f32[4,32], index: 2, kind: input, shape index: {}]   ;;  %s416_s3 = inlined_call_operand.hbm [shape: f32[16,32], index: 3, kind: output, shape index: {}]  }
   0x1   :  { %9 = vsyncpa [#allocation6], 0 }
   0x2   :  { %10 = vsyncpa [#allocation4], 0  ;;  %s337_s12 = smov [#allocation2]   ;;  %s265_s16 = scalar_lea.hbm %s413_s0, 256 }
   0x3   :  { %s16_s13 = sshll.u32 %s337_s12, 4  ;;  %p266_p0 = scmp.ne.s32.totalorder %s413_s0, %s265_s16  ;;  %s17_s13 = int_to_ptr.vmem [resolvable:$true] %s16_s13 }
   0x4   :  { %p269_p1 = scmp.lt.u32.totalorder %s265_s16, %s413_s0 }
   0x6   :  { %p271_p2 = pnand %p269_p1, %p266_p0 }
   0x8   :  { %274 = shalt.err (!%p271_p2)
}
   0x9   :  { %s275_s21 = scalar_lea.vmem %s17_s13, 256  ;;  %p280_p4 = scmp.lt.s32.totalorder %s17_s13, %s17_s13 }
   0xa   :  { %p276_p3 = scmp.ne.s32.totalorder %s17_s13, %s275_s21  ;;  %p281_p5 = scmp.lt.s32.totalorder %s275_s21, %s275_s21 }
   0xc   :  { %p282_p6 = por %p281_p5, %p280_p4 }
   0xe   :  { %p283_p7 = pnand %p282_p6, %p276_p3 }
  0x10   :  { %286 = shalt.err (!%p283_p7)
}
  0x11   :  { %s338_s22 = smov 128   ;;  %s339_s23 = smov 8  }
  0x12   :  { %22 = dma.hbm_to_vmem [thread:$0]  %s413_s0, 256, %s17_s13, [#allocation3], %s338_s22, %s338_s22, %s339_s23  }
  0x13   :  { %s340_s26 = smov [#allocation5]   ;;  %s287_s30 = scalar_lea.hbm %s414_s1, 64 }
  0x14   :  { %s29_s27 = sshll.u32 %s340_s26, 4  ;;  %p288_p8 = scmp.ne.s32.totalorder %s414_s1, %s287_s30  ;;  %s30_s27 = int_to_ptr.vmem [resolvable:$true] %s29_s27 }
  0x15   :  { %p291_p9 = scmp.lt.u32.totalorder %s287_s30, %s414_s1 }
  0x17   :  { %p293_p10 = pnand %p291_p9, %p288_p8 }
  0x19   :  { %296 = shalt.err (!%p293_p10)
}
  0x1a   :  { %s297_s8 = scalar_lea.vmem %s30_s27, 64  ;;  %p302_p12 = scmp.lt.s32.totalorder %s30_s27, %s30_s27 }
  0x1b   :  { %p298_p11 = scmp.ne.s32.totalorder %s30_s27, %s297_s8  ;;  %p303_p13 = scmp.lt.s32.totalorder %s297_s8, %s297_s8 }
  0x1d   :  { %p304_p0 = por %p303_p13, %p302_p12 }
  0x1f   :  { %p305_p1 = pnand %p304_p0, %p298_p11 }
  0x21   :  { %308 = shalt.err (!%p305_p1)
}
  0x22   :  { %32 = dma.hbm_to_vmem [thread:$0]  %s414_s1, 64, %s30_s27, [#allocation6]  }
  0x23   :  { %331 = dma.done.wait [#allocation3], 256  }
  0x24   :  { %332 = vsyncadd [#allocation3], 4294967040 }
  0x25   :  { %333 = dma.done.wait [#allocation6], 64  }
  0x26   :  { %334 = vsyncadd [#allocation6], 4294967232  ;;  %vm45_vm0 = vcmask 261120   ;;  %v41_v0 = vld [vmem:[#allocation5] sm:$0xf]  ;;  %v43_v1 = vld [vmem:[#allocation2] sm:$0xff] }
  0x27   :  { %250 = vmatprep.subr.msk.mxu0 %vm45_vm0, %v41_v0  ;;  %252 = vmatprep.mubr.msk.f32.mxu0 %vm45_vm0, %v43_v1  ;;  %v44_v2 = vld [vmem:[#allocation2 + $0x8] sm:$0xff]  ;;  %v42_v3 = vld [vmem:[%s415_s2] sm:$0xf]  ;;  %vm139_vm1 = vcmask 1043456   ;;  %vm132_vm2 = vcmask 31744   ;;  %s341_s1 = smov [#allocation7]  }
  0x28   :  { %251 = vmatpush3.xpose.msk.msra.mxu0 %vm45_vm0, %v41_v0  ;;  %255 = vmatprep.subr.msk.mxu1 %vm139_vm1, %v42_v3  ;;  %s225_s12 = sshll.u32 %s341_s1, 4  ;;  %s226_s12 = int_to_ptr.vmem [resolvable:$true] %s225_s12 }
  0x29   :  { %256 = vmatpush3.msk.msra.mxu1 %vm139_vm1, %v42_v3  ;;  %s309_s2 = scalar_lea.vmem %s226_s12, 256  ;;  %p314_p3 = scmp.lt.s32.totalorder %s226_s12, %s226_s12 }
  0x2a   :  { %p310_p2 = scmp.ne.s32.totalorder %s226_s12, %s309_s2  ;;  %p315_p4 = scmp.lt.s32.totalorder %s309_s2, %s309_s2 }
  0x2b   :  { %253 = vmatmul.mubr.msk.f32.vlgmr.msra.gmra.mrb[0].mxu0 %vm45_vm0, %v44_v2 }
  0x2c   :  { %p316_p5 = por %p315_p4, %p314_p3 }
  0x2e   :  { %p317_p6 = pnand %p316_p5, %p310_p2 }
  0xfe   :  { %v254_v4 = vpop.f32.mrb[0].mxu0 }
  0xff   :  { %v121_v5 = vpop.f32.mrb[1].mxu0  ;;  %v131_v7 = vmul.f32 2.0, %v254_v4 }
 0x100   :  { %v130_v6 = vmul.f32 2.0, %v121_v5 }
 0x102   :  { %257 = vmatprep.mubr.msk.f32.mxu1 %vm132_vm2, %v130_v6 }
 0x103   :  { %258 = vmatmul.mubr.msk.f32.vlgmr.msra.gmra.mrb[0].mxu1 %vm132_vm2, %v131_v7 }
 0x1d6   :  { %v259_v8 = vpop.f32.mrb[0].mxu1 }
 0x1d7   :  { %219 = vst.msk [vmem:[#allocation7 + $0x8] sm:$0xff] %vm45_vm0, %v259_v8  ;;  %v209_v9 = vpop.f32.mrb[1].mxu1 }
 0x1d8   :  { %218 = vst.msk [vmem:[#allocation7] sm:$0xff] %vm45_vm0, %v209_v9 }
 0x1d9   :  { %320 = shalt.err (!%p317_p6)
}
 0x1da   :  { %s321_s15 = scalar_lea.hbm %s416_s3, 256 }
 0x1db   :  { %p322_p7 = scmp.ne.s32.totalorder %s416_s3, %s321_s15  ;;  %p325_p8 = scmp.lt.u32.totalorder %s321_s15, %s416_s3 }
 0x1dd   :  { %p327_p9 = pnand %p325_p8, %p322_p7 }
 0x1df   :  { %330 = shalt.err (!%p327_p9)
}
 0x1e0   :  { %231 = dma.vmem_to_hbm [thread:$0]  %s226_s12, 256, %s416_s3, [#allocation4], %s338_s22, %s338_s22, %s339_s23  }
 0x1e1   :  { %335 = dma.done.wait [#allocation4], 256  }
 0x1e2   :  { %336 = vsyncadd [#allocation4], 4294967040 }
 0x1e3   :  { %235 = vsyncpa [#allocation3], 1 }
 0x1e4   :  { %236 = vsyncpa [#allocation6], 1 }
 0x1e5   :  { %237 = vsyncpa [#allocation4], 1 }

</bundles_post_ra>
